<compile_context>
chip_gen: v5e
topology: v5e:2x2
jax: 0.10.0
libtpu: 0.0.40
codegen_flags: <defaults>
</compile_context>

<pallas_src>
import functools

import jax
import jax.numpy as jnp
from jax.experimental import pallas as pl
from jax.experimental.pallas import tpu as pltpu


def _round_up(a: int, b: int) -> int:
    return (a + b - 1) // b * b


def _lora_kernel(x_ref, a_t_ref, b_t_ref, o_ref, xa_ref, *, scaling):
    # x_ref:   (TM, in_features)
    # a_t_ref: (in_features, rank)   == lora_A.T  (whole weight, VMEM resident)
    # b_t_ref: (rank, TN)            == lora_B.T tile
    # o_ref:   (TM, TN)
    # xa_ref:  (TM, rank) f32 scratch; persists across the N (j) grid axis.

    # The low-rank projection only depends on the M tile, so compute it once
    # per M tile (when the N index is 0) and reuse it for every N tile.
    @pl.when(pl.program_id(1) == 0)
    def _():
        xa_ref[...] = (
            jnp.dot(x_ref[...], a_t_ref[...], preferred_element_type=jnp.float32)
            * scaling
        )

    o_ref[...] = jnp.dot(
        xa_ref[...], b_t_ref[...], preferred_element_type=jnp.float32
    ).astype(o_ref.dtype)


def lora_forward(
    x,
    lora_A,
    lora_B,
    *,
    alpha: float = 16.0,
    tm: int = 256,                     # M tile (rows); sweep 256-1024 per chip gen.
    tn: int = 512,                     # out_features tile (multiple of 128 lanes).
    vmem_limit_bytes: int = 48 << 20,  # safe on v7x (64 MiB phys); raise to 96<<20 on v6e.
):
    """LoRA forward: x @ lora_A.T @ lora_B.T * (alpha / rank).

    x: (..., in_features); lora_A: (rank, in_features); lora_B: (out_features, rank).
    Dropout is treated as identity (eval mode).
    """
    rank, in_features = lora_A.shape
    out_features = lora_B.shape[0]
    scaling = alpha / rank

    lead_shape = x.shape[:-1]
    m = 1
    for d in lead_shape:
        m *= d
    x2d = x.reshape(m, in_features)

    # NOTE: in a real model store the LoRA weights pre-transposed (reused
    # across calls) so no per-call transpose op is emitted; they are tiny here.
    a_t = lora_A.T                      # (in_features, rank)
    b_t = lora_B.T                      # (rank, out_features)

    # --- tile selection -----------------------------------------------------
    # M tile: multiple of 8 sublanes; never larger than (padded) M.
    tm_eff = min(_round_up(tm, 8), _round_up(m, 8))
    m_pad = _round_up(m, tm_eff)
    if m_pad != m:
        x2d = jnp.pad(x2d, ((0, m_pad - m), (0, 0)))

    # N tile: lane-dense multiple of 128 when it divides out_features,
    # otherwise fall back to the full (untiled) out_features dimension.
    if tn % 128 == 0 and out_features % tn == 0:
        tn_eff = tn
    else:
        tn_eff = out_features

    grid = (m_pad // tm_eff, out_features // tn_eff)

    # Advisory cost estimate so XLA schedules this call sensibly next to the
    # base-layer matmul it usually sits beside.
    w_bytes = (rank * in_features + out_features * rank) * lora_A.dtype.itemsize
    io_bytes = m * (in_features + out_features) * x.dtype.itemsize
    cost = pl.CostEstimate(
        flops=2 * m * rank * (in_features + out_features),
        transcendentals=0,
        bytes_accessed=int(io_bytes + w_bytes),
    )

    kernel = functools.partial(_lora_kernel, scaling=scaling)
    out2d = pl.pallas_call(
        kernel,
        out_shape=jax.ShapeDtypeStruct((m_pad, out_features), x.dtype),
        grid_spec=pltpu.PrefetchScalarGridSpec(
            num_scalar_prefetch=0,
            grid=grid,
            in_specs=[
                pl.BlockSpec((tm_eff, in_features), lambda i, j: (i, 0)),
                pl.BlockSpec((in_features, rank), lambda i, j: (0, 0)),
                pl.BlockSpec((rank, tn_eff), lambda i, j: (0, j)),
            ],
            out_specs=pl.BlockSpec((tm_eff, tn_eff), lambda i, j: (i, j)),
            scratch_shapes=[pltpu.VMEM((tm_eff, rank), jnp.float32)],
        ),
        compiler_params=pltpu.CompilerParams(
            # j carries the xa-scratch dependency -> "arbitrary"; i is free to
            # shard across the two TensorCores on v7x.
            dimension_semantics=("parallel", "arbitrary"),
            vmem_limit_bytes=vmem_limit_bytes,
        ),
        cost_estimate=cost,
    )(x2d, a_t, b_t)

    if m_pad != m:
        out2d = out2d[:m]
    return out2d.reshape(*lead_shape, out_features)


def _ref(x, lora_A, lora_B, alpha):
    rank = lora_A.shape[0]
    return (x @ lora_A.T @ lora_B.T) * (alpha / rank)


if __name__ == "__main__":
    key = jax.random.PRNGKey(0)
    kx, ka, kb, kx2, ka2, kb2 = jax.random.split(key, 6)

    # --- small shapes consistent with the module's forward -------------------
    batch, seq = 2, 8
    in_features, out_features, rank, alpha = 32, 32, 16, 16.0

    x = jax.random.normal(kx, (batch, seq, in_features), dtype=jnp.float32)

    # Deterministic parameter init mirroring LoRALayer.__init__:
    #   lora_A = randn(rank, in) * 0.01 ; lora_B = zeros(out, rank)
    lora_A = jax.random.normal(ka, (rank, in_features), dtype=jnp.float32) * 0.01
    lora_B = jnp.zeros((out_features, rank), dtype=jnp.float32)

    out = lora_forward(x, lora_A, lora_B, alpha=alpha)
    jax.block_until_ready(out)
    ref = _ref(x, lora_A, lora_B, alpha)
    assert jnp.allclose(out, ref, atol=1e-5), "mismatch with zero-init B"

    # Nonzero B to actually exercise the two-matmul path.
    lora_B_nz = jax.random.normal(kb, (out_features, rank), dtype=jnp.float32) * 0.01
    out_nz = lora_forward(x, lora_A, lora_B_nz, alpha=alpha)
    jax.block_until_ready(out_nz)
    ref_nz = _ref(x, lora_A, lora_B_nz, alpha)
    assert jnp.allclose(out_nz, ref_nz, atol=1e-5), "mismatch with nonzero B"

    # --- ragged M + tiled out_features path (padding, N-tiling, scratch reuse)
    b2, s2, in2, out2, rank2 = 3, 37, 128, 1024, 8
    x2 = jax.random.normal(kx2, (b2, s2, in2), dtype=jnp.float32)
    A2 = jax.random.normal(ka2, (rank2, in2), dtype=jnp.float32) * 0.01
    B2 = jax.random.normal(kb2, (out2, rank2), dtype=jnp.float32) * 0.01
    out2_k = lora_forward(x2, A2, B2, alpha=alpha)
    jax.block_until_ready(out2_k)
    ref2 = _ref(x2, A2, B2, alpha)
    assert jnp.allclose(out2_k, ref2, atol=1e-5), "mismatch on ragged/tiled path"

    print("KERNEL_OK")
</pallas_src>

<mosaic_0001>
module attributes {stable_mosaic.version = 11 : i64} {
  func.func @_lora_kernel(%arg0: i32, %arg1: i32, %arg2: memref<16x32xf32, #tpu.memory_space<vmem>>, %arg3: memref<32x16xf32, #tpu.memory_space<vmem>>, %arg4: memref<16x32xf32, #tpu.memory_space<vmem>>, %arg5: memref<16x32xf32, #tpu.memory_space<vmem>>, %arg6: memref<16x16xf32, #tpu.memory_space<vmem>>) attributes {dimension_semantics = [#tpu.dimension_semantics<parallel>, #tpu.dimension_semantics<arbitrary>], iteration_bounds = array<i64: 1, 1>, scalar_prefetch = 0 : i64, scratch_operands = 1 : i64, tpu.core_type = #tpu.core_type<tc>, window_params = [{transform_indices = @transform_0, window_bounds = array<i64: 16, 32>}, {pipeline_mode = #tpu.pipeline_mode<synchronous>, transform_indices = @transform_1, window_bounds = array<i64: 32, 16>}, {transform_indices = @transform_2, window_bounds = array<i64: 16, 32>}, {transform_indices = @transform_3, window_bounds = array<i64: 16, 32>}]} {
    %c0_i32 = arith.constant 0 : i32
    %0 = arith.cmpi eq, %arg1, %c0_i32 : i32
    %1 = arith.extui %0 : i1 to i32
    %c0_i32_0 = arith.constant 0 : i32
    %2 = arith.cmpi ne, %1, %c0_i32_0 : i32
    scf.if %2 {
      %c0_6 = arith.constant 0 : index
      %c0_7 = arith.constant 0 : index
      %7 = vector.load %arg2[%c0_6, %c0_7] : memref<16x32xf32, #tpu.memory_space<vmem>>, vector<16x32xf32>
      %c0_8 = arith.constant 0 : index
      %c0_9 = arith.constant 0 : index
      %8 = vector.load %arg3[%c0_8, %c0_9] : memref<32x16xf32, #tpu.memory_space<vmem>>, vector<32x16xf32>
      %cst_10 = arith.constant dense<0.000000e+00> : vector<16x16xf32>
      %9 = tpu.matmul %7, %8, %cst_10 {dimension_numbers = #tpu.dot_dimension_numbers<[1], [0], [0], [1], [0, 0, 1, 1], [], []>} : vector<16x32xf32>, vector<32x16xf32>, vector<16x16xf32> -> vector<16x16xf32>
      %cst_11 = arith.constant 1.000000e+00 : f32
      %10 = vector.broadcast %cst_11 : f32 to vector<16x16xf32>
      %11 = arith.mulf %9, %10 : vector<16x16xf32>
      %c0_12 = arith.constant 0 : index
      %c0_13 = arith.constant 0 : index
      %12 = vector.load %arg6[%c0_12, %c0_13] : memref<16x16xf32, #tpu.memory_space<vmem>>, vector<16x16xf32>
      tpu.vector_store %arg6[%c0_12, %c0_13], %11 {strides = array<i32>} : memref<16x16xf32, #tpu.memory_space<vmem>>, vector<16x16xf32>,
    } else {
    }
    %c0 = arith.constant 0 : index
    %c0_1 = arith.constant 0 : index
    %3 = vector.load %arg6[%c0, %c0_1] : memref<16x16xf32, #tpu.memory_space<vmem>>, vector<16x16xf32>
    %c0_2 = arith.constant 0 : index
    %c0_3 = arith.constant 0 : index
    %4 = vector.load %arg4[%c0_2, %c0_3] : memref<16x32xf32, #tpu.memory_space<vmem>>, vector<16x32xf32>
    %cst = arith.constant dense<0.000000e+00> : vector<16x32xf32>
    %5 = tpu.matmul %3, %4, %cst {dimension_numbers = #tpu.dot_dimension_numbers<[1], [0], [0], [1], [0, 0, 1, 1], [], []>} : vector<16x16xf32>, vector<16x32xf32>, vector<16x32xf32> -> vector<16x32xf32>
    %c0_4 = arith.constant 0 : index
    %c0_5 = arith.constant 0 : index
    %6 = vector.load %arg5[%c0_4, %c0_5] : memref<16x32xf32, #tpu.memory_space<vmem>>, vector<16x32xf32>
    tpu.vector_store %arg5[%c0_4, %c0_5], %5 {strides = array<i32>} : memref<16x32xf32, #tpu.memory_space<vmem>>, vector<16x32xf32>,
    return
  }
  func.func @transform_0(%arg0: i32, %arg1: i32) -> (i32, i32) {
    %c0_i32 = arith.constant 0 : i32
    %c0_i32_0 = arith.constant 0 : i32
    return %arg0, %c0_i32 : i32, i32
  }
  func.func @transform_1(%arg0: i32, %arg1: i32) -> (i32, i32) {
    %c0_i32 = arith.constant 0 : i32
    %c0_i32_0 = arith.constant 0 : i32
    %c0_i32_1 = arith.constant 0 : i32
    return %c0_i32, %c0_i32_0 : i32, i32
  }
  func.func @transform_2(%arg0: i32, %arg1: i32) -> (i32, i32) {
    %c0_i32 = arith.constant 0 : i32
    %c0_i32_0 = arith.constant 0 : i32
    return %c0_i32, %arg1 : i32, i32
  }
  func.func @transform_3(%arg0: i32, %arg1: i32) -> (i32, i32) {
    %c0_i32 = arith.constant 0 : i32
    return %arg0, %arg1 : i32, i32
  }
}

</mosaic_0001>

<bundles_post_ra>
// kernel: tpu_custom_call.1
= control target key start
LH: loop header
LB: loop body
LE: loop exit
PB: predicated region body
PF: predicated region fallthrough
CT: control target
= control target key end

     0   :  { %s206_s0 = inlined_call_operand.vmem [shape: f32[16,32], index: 0, kind: input, shape index: {}]   ;;  %s207_s1 = inlined_call_operand.vmem [shape: f32[32,16], index: 1, kind: input, shape index: {}]   ;;  %s208_s2 = inlined_call_operand.vmem [shape: f32[16,32], index: 2, kind: input, shape index: {}]   ;;  %s209_s3 = inlined_call_operand.hbm [shape: f32[16,32], index: 3, kind: output, shape index: {}]  }
   0x1   :  { %v24_v0 = vld [vmem:[%s207_s1 + $0x18] sm:$0xff]  ;;  %v23_v1 = vld [vmem:[%s207_s1 + $0x10] sm:$0xff]  ;;  %v22_v2 = vld [vmem:[%s207_s1 + $0x8] sm:$0xff] }
   0x2   :  { %117 = vmatpush.msra.mxu2 %v24_v0  ;;  %44 = vmatpush.msra.mxu0 %v24_v0 }
   0x3   :  { %8 = vsyncpa [#allocation4], 0  ;;  %v21_v3 = vld [vmem:[%s207_s1] sm:$0xff]  ;;  %v20_v4 = vld [vmem:[%s206_s0 + $0x8] sm:$0xff]  ;;  %vm25_vm0 = vcmask 261120   ;;  %vm55_vm1 = vcmask 130048  }
   0x4   :  { %118 = vmatpush.msra.mxu2 %v23_v1  ;;  %45 = vmatpush.msra.mxu0 %v23_v1  ;;  %v19_v5 = vld [vmem:[%s206_s0] sm:$0xff]  ;;  %v61_v6 = vld [vmem:[%s208_s2 + $0x8] sm:$0xff]  ;;  %s152_s0 = smov [#allocation3]   ;;  %s101_s29 = sshll.u32 %s209_s3, 4  ;;  %s102_s29 = int_to_ptr.hbm [resolvable:$true] %s101_s29 }
   0x5   :  { %v60_v7 = vld [vmem:[%s208_s2] sm:$0xff]  ;;  %121 = vmatpush.msra.mxu3 %v61_v6  ;;  %83 = vmatpush.msra.mxu1 %v61_v6  ;;  %s99_s27 = sshll.u32 %s152_s0, 4  ;;  %s153_s30 = smov 128   ;;  %s100_s27 = int_to_ptr.vmem [resolvable:$true] %s99_s27 }
   0x6   :  { %119 = vmatpush.msra.mxu2 %v22_v2  ;;  %46 = vmatpush.msra.mxu0 %v22_v2  ;;  %s154_s4 = smov 8  }
   0x7   :  { %122 = vmatpush.msra.mxu3 %v60_v7  ;;  %84 = vmatpush.msra.mxu1 %v60_v7 }
   0x8   :  { %120 = vmatpush.msra.mxu2 %v21_v3  ;;  %47 = vmatpush.msra.mxu0 %v21_v3 }
   0x9   :  { %114 = vmatmul.msk.f32.vlgmr.msra.gmra.mxu2 %vm25_vm0, %v20_v4  ;;  %113 = vmatmul.msk.f32.vlgmr.msra.gmra.mxu0 %vm25_vm0, %v19_v5 }
  0x86   :  { %v49_v8 = vpop.f32.mrf.mxu0 }
  0x87   :  { %56 = vst.msk [vmem:[#allocation2] sm:$0xff] %vm55_vm1, %v49_v8 }
  0x8c   :  { %v52_v9 = vpop.f32.mrf.mxu2 }
  0x8d   :  { %57 = vst.msk [vmem:[#allocation2 + $0x8] sm:$0xff] %vm55_vm1, %v52_v9 }
  0x8e   :  { %v58_v10 = vld [vmem:[#allocation2] sm:$0xff] }
  0x8f   :  { %115 = vmatmul.msk.f32.vlgmr.msra.gmra.mxu1 %vm55_vm1, %v58_v10 }
  0x94   :  { %v59_v11 = vld [vmem:[#allocation2 + $0x8] sm:$0xff] }
  0x95   :  { %116 = vmatmul.msk.f32.vlgmr.msra.gmra.mxu3 %vm55_vm1, %v59_v11 }
 0x10c   :  { %v86_v12 = vpop.f32.mrf.mxu1 }
 0x10d   :  { %93 = vst.msk [vmem:[#allocation3] sm:$0xff] %vm25_vm0, %v86_v12 }
 0x118   :  { %v89_v13 = vpop.f32.mrf.mxu3 }
 0x119   :  { %94 = vst.msk [vmem:[#allocation3 + $0x8] sm:$0xff] %vm25_vm0, %v89_v13 }
 0x11a   :  { %107 = dma.vmem_to_hbm [thread:$0]  %s100_s27, 256, %s102_s29, [#allocation4], %s153_s30, %s153_s30, %s154_s4  }
 0x11b   :  { %150 = dma.done.wait [#allocation4], 256  }
 0x11c   :  { %151 = vsyncadd [#allocation4], 4294967040 }
 0x11d   :  { %112 = vsyncpa [#allocation4], 1 }

</bundles_post_ra>
